<compile_context>
chip_gen: v6e
topology: v6e:2x2x1
jax: 0.10.0
libtpu: 0.0.40
codegen_flags: <defaults>
</compile_context>

<pallas_src>
import jax
import jax.numpy as jnp
from jax.experimental import pallas as pl
from jax.experimental.pallas import tpu as pltpu


def _round_up(x, m):
    return ((x + m - 1) // m) * m


def _pad2d(a, rows, cols):
    return jnp.pad(a, ((0, rows - a.shape[0]), (0, cols - a.shape[1])))


def _make_ncf_mlp_kernel(n_hidden_layers):
    def kernel(x_ref, ws_ref, bs_ref, wf_ref, bf_ref, o_ref):
        # x_ref : (TB, P)   batch tile of concatenated embeddings (lane-dense)
        # ws_ref: (L, P, P) padded hidden-layer weights (VMEM-resident)
        # bs_ref: (L, 1, P) padded hidden-layer biases
        # wf_ref: (P, 1)    padded final-layer weight
        # bf_ref: (1, 1)    final-layer bias
        # o_ref : (TB, 1)   predictions for this batch tile
        x = x_ref[...]
        for l in range(n_hidden_layers):                      # static unroll (traced once)
            h = jnp.dot(x, ws_ref[l], preferred_element_type=jnp.float32)  # MXU
            x = jnp.maximum(h + bs_ref[l], 0.0)               # bias + ReLU (VPU)
        pred = jnp.dot(x, wf_ref[...], preferred_element_type=jnp.float32)
        o_ref[...] = pred + bf_ref[...]
    return kernel


def ncf_forward(user_idx, item_idx, u_table, i_table, weights, biases, *,
                batch_tile=512):
    """NCF forward.

    user_idx, item_idx : (B,) int32 indices
    u_table, i_table   : (userNum, dim) / (itemNum, dim) embedding tables
    weights            : list of PyTorch-layout (out_features, in_features) matrices,
                         fc layers first, final (1, layers[-1]) layer last
    biases             : matching list of (out_features,) vectors
    returns            : (B,) float32 predictions
    """
    # TODO(synk): the nn.Embedding row gather is data-dependent; it is performed with
    # XLA's native gather (jnp.take) in the wrapper rather than per-row DMA in-kernel.
    uembd = jnp.take(u_table, user_idx, axis=0)
    iembd = jnp.take(i_table, item_idx, axis=0)
    embd = jnp.concatenate([uembd, iembd], axis=1).astype(jnp.float32)

    B, F = embd.shape
    assert F == weights[0].shape[1], "concat width must equal first fc in_features"

    # Lane-dense padded width for all hidden activations / weights.
    P = _round_up(max(F, max(w.shape[0] for w in weights[:-1])), 128)
    L = len(weights) - 1                                       # number of hidden fc layers

    # Zero-pad hidden layers to (P, P) / (1, P) — inert under ReLU.
    ws = jnp.stack([_pad2d(w.T.astype(jnp.float32), P, P) for w in weights[:-1]])
    bs = jnp.stack([_pad2d(b.reshape(1, -1).astype(jnp.float32), 1, P)
                    for b in biases[:-1]])
    wf = _pad2d(weights[-1].T.astype(jnp.float32), P, 1)       # (P, 1)
    bf = biases[-1].reshape(1, 1).astype(jnp.float32)          # (1, 1)

    # Lane-pad the input features and sublane-pad the batch to the tile size.
    if F < P:
        embd = jnp.pad(embd, ((0, 0), (0, P - F)))
    TB = min(batch_tile, _round_up(B, 8))
    Bp = _round_up(B, TB)
    if Bp > B:
        embd = jnp.pad(embd, ((0, Bp - B), (0, 0)))

    out = pl.pallas_call(
        _make_ncf_mlp_kernel(L),
        out_shape=jax.ShapeDtypeStruct((Bp, 1), jnp.float32),
        grid_spec=pl.GridSpec(
            grid=(Bp // TB,),
            in_specs=[
                pl.BlockSpec((TB, P), lambda i: (i, 0)),       # streamed batch tile
                pl.BlockSpec((L, P, P), lambda i: (0, 0, 0)),  # resident weights
                pl.BlockSpec((L, 1, P), lambda i: (0, 0, 0)),  # resident biases
                pl.BlockSpec((P, 1), lambda i: (0, 0)),        # resident final weight
                pl.BlockSpec((1, 1), lambda i: (0, 0)),        # resident final bias
            ],
            out_specs=pl.BlockSpec((TB, 1), lambda i: (i, 0)),
        ),
        compiler_params=pltpu.CompilerParams(
            dimension_semantics=("parallel",)),                # megacore sharding on v7x
    )(embd, ws, bs, wf, bf)

    return out[:B, 0]                                          # .flatten()


def reference_forward(user_idx, item_idx, u_table, i_table, weights, biases):
    x = jnp.concatenate([jnp.take(u_table, user_idx, axis=0),
                         jnp.take(i_table, item_idx, axis=0)], axis=1)
    for W, b in zip(weights[:-1], biases[:-1]):
        x = jnp.maximum(
            jnp.dot(x, W.T, precision=jax.lax.Precision.HIGHEST) + b, 0.0)
    pred = jnp.dot(x, weights[-1].T, precision=jax.lax.Precision.HIGHEST) + biases[-1]
    return pred.reshape(-1)


if __name__ == "__main__":
    # Small, module-consistent sizes: dim=64 so concat width == layers[0] == 128.
    userNum, itemNum, dim = 48, 64, 64
    layers = [128, 64, 32, 8]
    B = 32

    key = jax.random.PRNGKey(0)
    k_u, k_i, k_ui, k_ii, k_w = jax.random.split(key, 5)

    u_table = jax.random.normal(k_u, (userNum, dim), dtype=jnp.float32)
    i_table = jax.random.normal(k_i, (itemNum, dim), dtype=jnp.float32)
    user_idx = jax.random.randint(k_ui, (B,), 0, userNum, dtype=jnp.int32)
    item_idx = jax.random.randint(k_ii, (B,), 0, itemNum, dtype=jnp.int32)

    # fc_layers: 128->64, 64->32, 32->8; finalLayer: 8->1 (PyTorch (out,in) layout).
    dims = layers + [1]
    wkeys = jax.random.split(k_w, 2 * (len(dims) - 1))
    weights, biases = [], []
    for li, (fan_in, fan_out) in enumerate(zip(dims[:-1], dims[1:])):
        bound = (1.0 / fan_in) ** 0.5                          # nn.Linear default init range
        weights.append(jax.random.uniform(wkeys[2 * li], (fan_out, fan_in),
                                          dtype=jnp.float32,
                                          minval=-bound, maxval=bound))
        biases.append(jax.random.uniform(wkeys[2 * li + 1], (fan_out,),
                                         dtype=jnp.float32,
                                         minval=-bound, maxval=bound))

    out = ncf_forward(user_idx, item_idx, u_table, i_table, weights, biases)
    out = jax.block_until_ready(out)

    ref = reference_forward(user_idx, item_idx, u_table, i_table, weights, biases)
    assert out.shape == (B,)
    max_err = float(jnp.max(jnp.abs(out - ref)))
    assert jnp.allclose(out, ref, atol=1e-4, rtol=1e-4), max_err

    print("KERNEL_OK")
</pallas_src>

<mosaic_0001>
module attributes {stable_mosaic.version = 11 : i64} {
  func.func @kernel(%arg0: i32, %arg1: memref<32x128xf32, #tpu.memory_space<vmem>>, %arg2: memref<3x128x128xf32, #tpu.memory_space<vmem>>, %arg3: memref<3x1x128xf32, #tpu.memory_space<vmem>>, %arg4: memref<128x1xf32, #tpu.memory_space<vmem>>, %arg5: memref<1x1xf32, #tpu.memory_space<vmem>>, %arg6: memref<32x1xf32, #tpu.memory_space<vmem>>) attributes {dimension_semantics = [#tpu.dimension_semantics<parallel>], iteration_bounds = array<i64: 1>, scalar_prefetch = 0 : i64, scratch_operands = 0 : i64, tpu.core_type = #tpu.core_type<tc>, window_params = [{transform_indices = @transform_0, window_bounds = array<i64: 32, 128>}, {pipeline_mode = #tpu.pipeline_mode<synchronous>, transform_indices = @transform_1, window_bounds = array<i64: 3, 128, 128>}, {pipeline_mode = #tpu.pipeline_mode<synchronous>, transform_indices = @transform_2, window_bounds = array<i64: 3, 1, 128>}, {pipeline_mode = #tpu.pipeline_mode<synchronous>, transform_indices = @transform_3, window_bounds = array<i64: 128, 1>}, {pipeline_mode = #tpu.pipeline_mode<synchronous>, transform_indices = @transform_4, window_bounds = array<i64: 1, 1>}, {transform_indices = @transform_5, window_bounds = array<i64: 32, 1>}]} {
    %c0 = arith.constant 0 : index
    %c0_0 = arith.constant 0 : index
    %0 = vector.load %arg1[%c0, %c0_0] : memref<32x128xf32, #tpu.memory_space<vmem>>, vector<32x128xf32>
    %c0_1 = arith.constant 0 : index
    %c0_2 = arith.constant 0 : index
    %c0_3 = arith.constant 0 : index
    %1 = vector.load %arg2[%c0_1, %c0_2, %c0_3] : memref<3x128x128xf32, #tpu.memory_space<vmem>>, vector<1x128x128xf32>
    %2 = vector.shape_cast %1 : vector<1x128x128xf32> to vector<128x128xf32>
    %cst = arith.constant dense<0.000000e+00> : vector<32x128xf32>
    %3 = tpu.matmul %0, %2, %cst {dimension_numbers = #tpu.dot_dimension_numbers<[1], [0], [0], [1], [0, 0, 1, 1], [], []>} : vector<32x128xf32>, vector<128x128xf32>, vector<32x128xf32> -> vector<32x128xf32>
    %c0_4 = arith.constant 0 : index
    %c0_5 = arith.constant 0 : index
    %c0_6 = arith.constant 0 : index
    %4 = vector.load %arg3[%c0_4, %c0_5, %c0_6] : memref<3x1x128xf32, #tpu.memory_space<vmem>>, vector<1x1x128xf32>
    %5 = vector.shape_cast %4 : vector<1x1x128xf32> to vector<1x128xf32>
    %6 = vector.broadcast %5 : vector<1x128xf32> to vector<32x128xf32>
    %7 = arith.addf %3, %6 : vector<32x128xf32>
    %cst_7 = arith.constant 0.000000e+00 : f32
    %8 = vector.broadcast %cst_7 : f32 to vector<32x128xf32>
    %9 = arith.maximumf %7, %8 : vector<32x128xf32>
    %c1 = arith.constant 1 : index
    %c0_8 = arith.constant 0 : index
    %c0_9 = arith.constant 0 : index
    %10 = vector.load %arg2[%c1, %c0_8, %c0_9] : memref<3x128x128xf32, #tpu.memory_space<vmem>>, vector<1x128x128xf32>
    %11 = vector.shape_cast %10 : vector<1x128x128xf32> to vector<128x128xf32>
    %cst_10 = arith.constant dense<0.000000e+00> : vector<32x128xf32>
    %12 = tpu.matmul %9, %11, %cst_10 {dimension_numbers = #tpu.dot_dimension_numbers<[1], [0], [0], [1], [0, 0, 1, 1], [], []>} : vector<32x128xf32>, vector<128x128xf32>, vector<32x128xf32> -> vector<32x128xf32>
    %c1_11 = arith.constant 1 : index
    %c0_12 = arith.constant 0 : index
    %c0_13 = arith.constant 0 : index
    %13 = vector.load %arg3[%c1_11, %c0_12, %c0_13] : memref<3x1x128xf32, #tpu.memory_space<vmem>>, vector<1x1x128xf32>
    %14 = vector.shape_cast %13 : vector<1x1x128xf32> to vector<1x128xf32>
    %15 = vector.broadcast %14 : vector<1x128xf32> to vector<32x128xf32>
    %16 = arith.addf %12, %15 : vector<32x128xf32>
    %cst_14 = arith.constant 0.000000e+00 : f32
    %17 = vector.broadcast %cst_14 : f32 to vector<32x128xf32>
    %18 = arith.maximumf %16, %17 : vector<32x128xf32>
    %c2 = arith.constant 2 : index
    %c0_15 = arith.constant 0 : index
    %c0_16 = arith.constant 0 : index
    %19 = vector.load %arg2[%c2, %c0_15, %c0_16] : memref<3x128x128xf32, #tpu.memory_space<vmem>>, vector<1x128x128xf32>
    %20 = vector.shape_cast %19 : vector<1x128x128xf32> to vector<128x128xf32>
    %cst_17 = arith.constant dense<0.000000e+00> : vector<32x128xf32>
    %21 = tpu.matmul %18, %20, %cst_17 {dimension_numbers = #tpu.dot_dimension_numbers<[1], [0], [0], [1], [0, 0, 1, 1], [], []>} : vector<32x128xf32>, vector<128x128xf32>, vector<32x128xf32> -> vector<32x128xf32>
    %c2_18 = arith.constant 2 : index
    %c0_19 = arith.constant 0 : index
    %c0_20 = arith.constant 0 : index
    %22 = vector.load %arg3[%c2_18, %c0_19, %c0_20] : memref<3x1x128xf32, #tpu.memory_space<vmem>>, vector<1x1x128xf32>
    %23 = vector.shape_cast %22 : vector<1x1x128xf32> to vector<1x128xf32>
    %24 = vector.broadcast %23 : vector<1x128xf32> to vector<32x128xf32>
    %25 = arith.addf %21, %24 : vector<32x128xf32>
    %cst_21 = arith.constant 0.000000e+00 : f32
    %26 = vector.broadcast %cst_21 : f32 to vector<32x128xf32>
    %27 = arith.maximumf %25, %26 : vector<32x128xf32>
    %c0_22 = arith.constant 0 : index
    %c0_23 = arith.constant 0 : index
    %28 = vector.load %arg4[%c0_22, %c0_23] : memref<128x1xf32, #tpu.memory_space<vmem>>, vector<128x1xf32>
    %cst_24 = arith.constant dense<0.000000e+00> : vector<32x1xf32>
    %29 = tpu.matmul %27, %28, %cst_24 {dimension_numbers = #tpu.dot_dimension_numbers<[1], [0], [0], [1], [0, 0, 1, 1], [], []>} : vector<32x128xf32>, vector<128x1xf32>, vector<32x1xf32> -> vector<32x1xf32>
    %c0_25 = arith.constant 0 : index
    %c0_26 = arith.constant 0 : index
    %30 = vector.load %arg5[%c0_25, %c0_26] : memref<1x1xf32, #tpu.memory_space<vmem>>, vector<1x1xf32>
    %31 = vector.broadcast %30 : vector<1x1xf32> to vector<32x1xf32>
    %32 = arith.addf %29, %31 : vector<32x1xf32>
    %c0_27 = arith.constant 0 : index
    %c0_28 = arith.constant 0 : index
    %33 = vector.load %arg6[%c0_27, %c0_28] : memref<32x1xf32, #tpu.memory_space<vmem>>, vector<32x1xf32>
    tpu.vector_store %arg6[%c0_27, %c0_28], %32 {strides = array<i32>} : memref<32x1xf32, #tpu.memory_space<vmem>>, vector<32x1xf32>,
    return
  }
  func.func @transform_0(%arg0: i32) -> (i32, i32) {
    %c0_i32 = arith.constant 0 : i32
    %c0_i32_0 = arith.constant 0 : i32
    return %arg0, %c0_i32 : i32, i32
  }
  func.func @transform_1(%arg0: i32) -> (i32, i32, i32) {
    %c0_i32 = arith.constant 0 : i32
    %c0_i32_0 = arith.constant 0 : i32
    %c0_i32_1 = arith.constant 0 : i32
    %c0_i32_2 = arith.constant 0 : i32
    return %c0_i32, %c0_i32_0, %c0_i32_1 : i32, i32, i32
  }
  func.func @transform_2(%arg0: i32) -> (i32, i32, i32) {
    %c0_i32 = arith.constant 0 : i32
    %c0_i32_0 = arith.constant 0 : i32
    %c0_i32_1 = arith.constant 0 : i32
    %c0_i32_2 = arith.constant 0 : i32
    return %c0_i32, %c0_i32_0, %c0_i32_1 : i32, i32, i32
  }
  func.func @transform_3(%arg0: i32) -> (i32, i32) {
    %c0_i32 = arith.constant 0 : i32
    %c0_i32_0 = arith.constant 0 : i32
    %c0_i32_1 = arith.constant 0 : i32
    return %c0_i32, %c0_i32_0 : i32, i32
  }
  func.func @transform_4(%arg0: i32) -> (i32, i32) {
    %c0_i32 = arith.constant 0 : i32
    %c0_i32_0 = arith.constant 0 : i32
    %c0_i32_1 = arith.constant 0 : i32
    return %c0_i32, %c0_i32_0 : i32, i32
  }
  func.func @transform_5(%arg0: i32) -> (i32, i32) {
    %c0_i32 = arith.constant 0 : i32
    %c0_i32_0 = arith.constant 0 : i32
    return %arg0, %c0_i32 : i32, i32
  }
}

</mosaic_0001>

<bundles_post_ra>
// kernel: tpu_custom_call.1
= control target key start
LH: loop header
LB: loop body
LE: loop exit
PB: predicated region body
PF: predicated region fallthrough
CT: control target
= control target key end

     0   :  { %s881_s0 = inlined_call_operand.vmem [shape: f32[32,128], index: 0, kind: input, shape index: {}]   ;;  %s882_s1 = inlined_call_operand.hbm [shape: f32[3,128,128], index: 1, kind: input, shape index: {}]   ;;  %s883_s2 = inlined_call_operand.vmem [shape: f32[3,1,128], index: 2, kind: input, shape index: {}]   ;;  %s884_s3 = inlined_call_operand.vmem [shape: f32[128,1], index: 3, kind: input, shape index: {}]   ;;  %s885_s4 = inlined_call_operand.<no memory space> [shape: f32[1,1], index: 4, kind: input, shape index: {}]   ;;  %s886_s5 = inlined_call_operand.vmem [shape: f32[32,1], index: 5, kind: output, shape index: {}]  }
   0x1   :  { %v10_v0 = vstv %s885_s4 }
   0x2   :  { %11 = vst [vmem:[#allocation2] sm:$0x1] %v10_v0 }
   0x3   :  { %12 = vsyncpa [#allocation4], 0  ;;  %s761_s20 = smov [#allocation3]  }
   0x4   :  { %s20_s21 = sshll.u32 %s761_s20, 4  ;;  %s21_s21 = int_to_ptr.vmem [resolvable:$true] %s20_s21 }
   0x5   :  { %s747_s22 = scalar_lea.vmem %s21_s21, 6144  ;;  %p752_p1 = scmp.lt.s32.totalorder %s21_s21, %s21_s21 }
   0x6   :  { %p748_p0 = scmp.ne.s32.totalorder %s21_s21, %s747_s22  ;;  %p753_p2 = scmp.lt.s32.totalorder %s747_s22, %s747_s22 }
   0x8   :  { %p754_p3 = por %p753_p2, %p752_p1 }
   0xa   :  { %p755_p4 = pnand %p754_p3, %p748_p0 }
   0xc   :  { %758 = shalt.err (!%p755_p4)
}
   0xd   :  { %s762_s23 = smov 128   ;;  %s763_s24 = smov 8  }
   0xe   :  { %26 = dma.hbm_to_vmem [thread:$0]  %s882_s1, 6144, %s21_s21, [#allocation4], %s762_s23, %s762_s23, %s763_s24  }
   0xf   :  { %759 = dma.done.wait [#allocation4], 6144  }
  0x10   :  { %760 = vsyncadd [#allocation4], 4294961152  ;;  %v55_v1 = vld [vmem:[#allocation3 + $0x78] sm:$0xff]  ;;  %v54_v2 = vld [vmem:[#allocation3 + $0x70] sm:$0xff]  ;;  %vm488_vm0 = vcmask 7168  }
  0x11   :  { %584 = vmatprep.subr.mxu0 %v55_v1  ;;  %v53_v3 = vld [vmem:[#allocation3 + $0x68] sm:$0xff]  ;;  %v52_v4 = vld [vmem:[#allocation3 + $0x60] sm:$0xff]  ;;  %v51_v6 = vld [vmem:[#allocation3 + $0x58] sm:$0xff] }
  0x12   :  { %585 = vmatpush3.msra.mxu0 %v55_v1  ;;  %v36_v5 = vld [vmem:[%s881_s0] sm:$0xff]  ;;  %v167_v8 = vld [vmem:[#allocation3 + $0xf0] sm:$0xff]  ;;  %v166_v10 = vld [vmem:[#allocation3 + $0xe8] sm:$0xff] }
  0x13   :  { %586 = vmatprep.subr.mxu0 %v54_v2  ;;  %616 = vmatprep.mubr.f32.mxu0 %v36_v5  ;;  %v168_v7 = vld [vmem:[#allocation3 + $0xf8] sm:$0xff]  ;;  %v50_v9 = vld [vmem:[#allocation3 + $0x50] sm:$0xff]  ;;  %v49_v11 = vld [vmem:[#allocation3 + $0x48] sm:$0xff] }
  0x14   :  { %587 = vmatpush3.msra.mxu0 %v54_v2  ;;  %622 = vmatprep.subr.mxu1 %v168_v7  ;;  %v165_v12 = vld [vmem:[#allocation3 + $0xe0] sm:$0xff]  ;;  %v164_v14 = vld [vmem:[#allocation3 + $0xd8] sm:$0xff]  ;;  %v163_v16 = vld [vmem:[#allocation3 + $0xd0] sm:$0xff] }
  0x15   :  { %588 = vmatprep.subr.mxu0 %v53_v3  ;;  %623 = vmatpush3.msra.mxu1 %v168_v7  ;;  %v48_v13 = vld [vmem:[#allocation3 + $0x40] sm:$0xff]  ;;  %v47_v15 = vld [vmem:[#allocation3 + $0x38] sm:$0xff]  ;;  %v46_v17 = vld [vmem:[#allocation3 + $0x30] sm:$0xff] }
  0x16   :  { %589 = vmatpush3.msra.mxu0 %v53_v3  ;;  %624 = vmatprep.subr.mxu1 %v167_v8  ;;  %v162_v18 = vld [vmem:[#allocation3 + $0xc8] sm:$0xff]  ;;  %v161_v20 = vld [vmem:[#allocation3 + $0xc0] sm:$0xff]  ;;  %v160_v22 = vld [vmem:[#allocation3 + $0xb8] sm:$0xff] }
  0x17   :  { %590 = vmatprep.subr.mxu0 %v52_v4  ;;  %625 = vmatpush3.msra.mxu1 %v167_v8  ;;  %v45_v19 = vld [vmem:[#allocation3 + $0x28] sm:$0xff]  ;;  %v44_v21 = vld [vmem:[#allocation3 + $0x20] sm:$0xff]  ;;  %v43_v23 = vld [vmem:[#allocation3 + $0x18] sm:$0xff] }
  0x18   :  { %591 = vmatpush3.msra.mxu0 %v52_v4  ;;  %626 = vmatprep.subr.mxu1 %v166_v10  ;;  %v159_v24 = vld [vmem:[#allocation3 + $0xb0] sm:$0xff]  ;;  %v158_v26 = vld [vmem:[#allocation3 + $0xa8] sm:$0xff]  ;;  %v157_v28 = vld [vmem:[#allocation3 + $0xa0] sm:$0xff] }
  0x19   :  { %592 = vmatprep.subr.mxu0 %v51_v6  ;;  %627 = vmatpush3.msra.mxu1 %v166_v10  ;;  %v42_v25 = vld [vmem:[#allocation3 + $0x10] sm:$0xff]  ;;  %v41_v27 = vld [vmem:[#allocation3 + $0x8] sm:$0xff]  ;;  %v40_v29 = vld [vmem:[#allocation3] sm:$0xff] }
  0x1a   :  { %593 = vmatpush3.msra.mxu0 %v51_v6  ;;  %628 = vmatprep.subr.mxu1 %v165_v12  ;;  %v37_v30 = vld [vmem:[%s881_s0 + $0x8] sm:$0xff]  ;;  %v38_v31 = vld [vmem:[%s881_s0 + $0x10] sm:$0xff]  ;;  %v39_v32 = vld [vmem:[%s881_s0 + $0x18] sm:$0xff] }
  0x1b   :  { %594 = vmatprep.subr.mxu0 %v50_v9  ;;  %629 = vmatpush3.msra.mxu1 %v165_v12  ;;  %v156_v33 = vld [vmem:[#allocation3 + $0x98] sm:$0xff]  ;;  %v155_v34 = vld [vmem:[#allocation3 + $0x90] sm:$0xff]  ;;  %v154_v35 = vld [vmem:[#allocation3 + $0x88] sm:$0xff] }
  0x1c   :  { %595 = vmatpush3.msra.mxu0 %v50_v9  ;;  %630 = vmatprep.subr.mxu1 %v164_v14  ;;  %v153_v36 = vld [vmem:[#allocation3 + $0x80] sm:$0xff]  ;;  %v282_v37 = vld [vmem:[#allocation3 + $0x178] sm:$0xff]  ;;  %v281_v38 = vld [vmem:[#allocation3 + $0x170] sm:$0xff] }
  0x1d   :  { %596 = vmatprep.subr.mxu0 %v49_v11  ;;  %631 = vmatpush3.msra.mxu1 %v164_v14  ;;  %v280_v39 = vld [vmem:[#allocation3 + $0x168] sm:$0xff]  ;;  %v279_v40 = vld [vmem:[#allocation3 + $0x160] sm:$0xff]  ;;  %v278_v41 = vld [vmem:[#allocation3 + $0x158] sm:$0xff] }
  0x1e   :  { %597 = vmatpush3.msra.mxu0 %v49_v11  ;;  %632 = vmatprep.subr.mxu1 %v163_v16  ;;  %v277_v42 = vld [vmem:[#allocation3 + $0x150] sm:$0xff]  ;;  %v276_v43 = vld [vmem:[#allocation3 + $0x148] sm:$0xff]  ;;  %v275_v44 = vld [vmem:[#allocation3 + $0x140] sm:$0xff] }
  0x1f   :  { %598 = vmatprep.subr.mxu0 %v48_v13  ;;  %633 = vmatpush3.msra.mxu1 %v163_v16  ;;  %v274_v45 = vld [vmem:[#allocation3 + $0x138] sm:$0xff]  ;;  %v273_v46 = vld [vmem:[#allocation3 + $0x130] sm:$0xff]  ;;  %v272_v47 = vld [vmem:[#allocation3 + $0x128] sm:$0xff] }
  0x20   :  { %599 = vmatpush3.msra.mxu0 %v48_v13  ;;  %634 = vmatprep.subr.mxu1 %v162_v18  ;;  %v271_v48 = vld [vmem:[#allocation3 + $0x120] sm:$0xff]  ;;  %v498_v49 = vld [vmem:[%s883_s2] ss:$0 sm:$0xff]  ;;  %v269_v63 = vld [vmem:[#allocation3 + $0x110] sm:$0xff] }
  0x21   :  { %600 = vmatprep.subr.mxu0 %v47_v15  ;;  %635 = vmatpush3.msra.mxu1 %v162_v18  ;;  %v270_v62 = vld [vmem:[#allocation3 + $0x118] sm:$0xff]  ;;  %v268_v0 = vld [vmem:[#allocation3 + $0x108] sm:$0xff]  ;;  %v267_v1 = vld [vmem:[#allocation3 + $0x100] sm:$0xff] }
  0x22   :  { %601 = vmatpush3.msra.mxu0 %v47_v15  ;;  %636 = vmatprep.subr.mxu1 %v161_v20  ;;  %v395_v2 = vld [vmem:[%s884_s3 + $0x78] sm:$0xff]  ;;  %v394_v3 = vld [vmem:[%s884_s3 + $0x70] sm:$0xff]  ;;  %v393_v4 = vld [vmem:[%s884_s3 + $0x68] sm:$0xff] }
  0x23   :  { %602 = vmatprep.subr.mxu0 %v46_v17  ;;  %637 = vmatpush3.msra.mxu1 %v161_v20  ;;  %v392_v5 = vld [vmem:[%s884_s3 + $0x60] sm:$0xff]  ;;  %v391_v6 = vld [vmem:[%s884_s3 + $0x58] sm:$0xff]  ;;  %v390_v7 = vld [vmem:[%s884_s3 + $0x50] sm:$0xff] }
  0x24   :  { %603 = vmatpush3.msra.mxu0 %v46_v17  ;;  %638 = vmatprep.subr.mxu1 %v160_v22  ;;  %v389_v8 = vld [vmem:[%s884_s3 + $0x48] sm:$0xff]  ;;  %v388_v9 = vld [vmem:[%s884_s3 + $0x40] sm:$0xff]  ;;  %v387_v10 = vld [vmem:[%s884_s3 + $0x38] sm:$0xff] }
  0x25   :  { %604 = vmatprep.subr.mxu0 %v45_v19  ;;  %639 = vmatpush3.msra.mxu1 %v160_v22  ;;  %v386_v11 = vld [vmem:[%s884_s3 + $0x30] sm:$0xff]  ;;  %v385_v12 = vld [vmem:[%s884_s3 + $0x28] sm:$0xff]  ;;  %v384_v13 = vld [vmem:[%s884_s3 + $0x20] sm:$0xff] }
  0x26   :  { %605 = vmatpush3.msra.mxu0 %v45_v19  ;;  %640 = vmatprep.subr.mxu1 %v159_v24  ;;  %v500_v14 = vld [vmem:[%s883_s2 + $0x1] ss:$0 sm:$0xff] }
  0x27   :  { %606 = vmatprep.subr.mxu0 %v44_v21  ;;  %641 = vmatpush3.msra.mxu1 %v159_v24 }
  0x28   :  { %607 = vmatpush3.msra.mxu0 %v44_v21  ;;  %642 = vmatprep.subr.mxu1 %v158_v26 }
  0x29   :  { %608 = vmatprep.subr.mxu0 %v43_v23  ;;  %643 = vmatpush3.msra.mxu1 %v158_v26 }
  0x2a   :  { %609 = vmatpush3.msra.mxu0 %v43_v23  ;;  %644 = vmatprep.subr.mxu1 %v157_v28 }
  0x2b   :  { %610 = vmatprep.subr.mxu0 %v42_v25  ;;  %645 = vmatpush3.msra.mxu1 %v157_v28  ;;  %v382_v28 = vld [vmem:[%s884_s3 + $0x10] sm:$0xff] }
  0x2c   :  { %611 = vmatpush3.msra.mxu0 %v42_v25  ;;  %646 = vmatprep.subr.mxu1 %v156_v33 }
  0x2d   :  { %612 = vmatprep.subr.mxu0 %v41_v27  ;;  %647 = vmatpush3.msra.mxu1 %v156_v33 }
  0x2e   :  { %613 = vmatpush3.msra.mxu0 %v41_v27  ;;  %648 = vmatprep.subr.mxu1 %v155_v34  ;;  %v383_v27 = vld [vmem:[%s884_s3 + $0x18] sm:$0xff] }
  0x2f   :  { %614 = vmatprep.subr.mxu0 %v40_v29  ;;  %649 = vmatpush3.msra.mxu1 %v155_v34 }
  0x30   :  { %615 = vmatpush3.msra.mxu0 %v40_v29  ;;  %650 = vmatprep.subr.mxu1 %v154_v35  ;;  %v381_v29 = vld [vmem:[%s884_s3 + $0x8] sm:$0xff] }
  0x31   :  { %617 = vmatmul.mubr.f32.vlgmr.msra.gmra.mxu0 %v37_v30  ;;  %651 = vmatpush3.msra.mxu1 %v154_v35  ;;  %v380_v30 = vld [vmem:[%s884_s3] sm:$0xff] }
  0x32   :  { %619 = vmatprep.mubr.f32.mxu0 %v38_v31  ;;  %652 = vmatprep.subr.mxu1 %v153_v36  ;;  %v502_v31 = vld [vmem:[%s883_s2 + $0x2] ss:$0 sm:$0xff] }
  0x33   :  { %653 = vmatpush3.msra.mxu1 %v153_v36  ;;  %660 = vmatprep.subr.mxu0 %v282_v37 }
  0x34   :  { %661 = vmatpush3.msra.mxu0 %v282_v37  ;;  %698 = vmatprep.subr.mxu1 %v395_v2 }
  0x35   :  { %620 = vmatmul.mubr.f32.gmra.mxu0 %v39_v32  ;;  %662 = vmatprep.subr.mxu0 %v281_v38 }
  0x36   :  { %663 = vmatpush3.msra.mxu0 %v281_v38 }
  0x37   :  { %664 = vmatprep.subr.mxu0 %v280_v39 }
  0x38   :  { %665 = vmatpush3.msra.mxu0 %v280_v39 }
  0x39   :  { %666 = vmatprep.subr.mxu0 %v279_v40 }
  0x3a   :  { %667 = vmatpush3.msra.mxu0 %v279_v40 }
  0x3b   :  { %668 = vmatprep.subr.mxu0 %v278_v41 }
  0x3c   :  { %669 = vmatpush3.msra.mxu0 %v278_v41 }
  0x3d   :  { %670 = vmatprep.subr.mxu0 %v277_v42 }
  0x3e   :  { %671 = vmatpush3.msra.mxu0 %v277_v42 }
  0x3f   :  { %672 = vmatprep.subr.mxu0 %v276_v43 }
  0x40   :  { %673 = vmatpush3.msra.mxu0 %v276_v43 }
  0x41   :  { %674 = vmatprep.subr.mxu0 %v275_v44 }
  0x42   :  { %675 = vmatpush3.msra.mxu0 %v275_v44  ;;  %v503_v44 = vld [vmem:[#allocation2] ss:$0 sm:$0xff] }
  0x43   :  { %676 = vmatprep.subr.mxu0 %v274_v45 }
  0x44   :  { %677 = vmatpush3.msra.mxu0 %v274_v45 }
  0x45   :  { %678 = vmatprep.subr.mxu0 %v273_v46 }
  0x46   :  { %679 = vmatpush3.msra.mxu0 %v273_v46 }
  0x47   :  { %680 = vmatprep.subr.mxu0 %v272_v47 }
  0x48   :  { %681 = vmatpush3.msra.mxu0 %v272_v47 }
  0x49   :  { %682 = vmatprep.subr.mxu0 %v271_v48 }
  0x4a   :  { %683 = vmatpush3.msra.mxu0 %v271_v48 }
  0x4b   :  { %684 = vmatprep.subr.mxu0 %v270_v62 }
  0x4c   :  { %685 = vmatpush3.msra.mxu0 %v270_v62 }
  0x4d   :  { %686 = vmatprep.subr.mxu0 %v269_v63 }
  0x4e   :  { %687 = vmatpush3.msra.mxu0 %v269_v63 }
  0x4f   :  { %688 = vmatprep.subr.mxu0 %v268_v0 }
  0x50   :  { %689 = vmatpush3.msra.mxu0 %v268_v0 }
  0x51   :  { %690 = vmatprep.subr.mxu0 %v267_v1 }
  0x52   :  { %691 = vmatpush3.msra.mxu0 %v267_v1 }
  0xf1   :  { %v618_v50 = vpop.f32.mrf.mxu0 }
  0xf2   :  { %v135_v51 = vadd.f32 %v618_v50, %v498_v49 }
  0xf3   :  { %v129_v52 = vpop.f32.mrf.mxu0 }
  0xf4   :  { %v130_v53 = vadd.f32 %v498_v49, %v129_v52  ;;  %v149_v56 = vmax.f32 %v135_v51, 0.0 }
  0xf5   :  { %v621_v54 = vpop.f32.mrf.mxu0 }
  0xf6   :  { %v148_v55 = vmax.f32 %v130_v53, 0.0  ;;  %v145_v57 = vadd.f32 %v621_v54, %v498_v49 }
  0xf7   :  { %v139_v58 = vpop.f32.mrf.mxu0 }
  0xf8   :  { %v140_v59 = vadd.f32 %v498_v49, %v139_v58  ;;  %654 = vmatprep.mubr.f32.mxu1 %v148_v55  ;;  %v151_v61 = vmax.f32 %v145_v57, 0.0 }
  0xf9   :  { %655 = vmatmul.mubr.f32.vlgmr.msra.gmra.mxu1 %v149_v56 }
  0xfa   :  { %v150_v60 = vmax.f32 %v140_v59, 0.0  ;;  %699 = vmatpush3.msra.mxu1 %v395_v2 }
  0xfb   :  { %700 = vmatprep.subr.mxu1 %v394_v3 }
  0xfc   :  { %657 = vmatprep.mubr.f32.mxu1 %v150_v60  ;;  %701 = vmatpush3.msra.mxu1 %v394_v3 }
  0xfd   :  { %658 = vmatmul.mubr.f32.gmra.mxu1 %v151_v61  ;;  %702 = vmatprep.subr.mxu1 %v393_v4 }
  0xfe   :  { %703 = vmatpush3.msra.mxu1 %v393_v4 }
  0xff   :  { %704 = vmatprep.subr.mxu1 %v392_v5 }
 0x100   :  { %705 = vmatpush3.msra.mxu1 %v392_v5 }
 0x101   :  { %706 = vmatprep.subr.mxu1 %v391_v6 }
 0x102   :  { %707 = vmatpush3.msra.mxu1 %v391_v6 }
 0x103   :  { %708 = vmatprep.subr.mxu1 %v390_v7 }
 0x104   :  { %709 = vmatpush3.msra.mxu1 %v390_v7 }
 0x105   :  { %710 = vmatprep.subr.mxu1 %v389_v8 }
 0x106   :  { %711 = vmatpush3.msra.mxu1 %v389_v8 }
 0x107   :  { %712 = vmatprep.subr.mxu1 %v388_v9 }
 0x108   :  { %713 = vmatpush3.msra.mxu1 %v388_v9 }
 0x109   :  { %714 = vmatprep.subr.mxu1 %v387_v10 }
 0x10a   :  { %715 = vmatpush3.msra.mxu1 %v387_v10 }
 0x10b   :  { %716 = vmatprep.subr.mxu1 %v386_v11 }
 0x10c   :  { %717 = vmatpush3.msra.mxu1 %v386_v11 }
 0x10d   :  { %718 = vmatprep.subr.mxu1 %v385_v12 }
 0x10e   :  { %719 = vmatpush3.msra.mxu1 %v385_v12 }
 0x10f   :  { %720 = vmatprep.subr.mxu1 %v384_v13 }
 0x110   :  { %721 = vmatpush3.msra.mxu1 %v384_v13 }
 0x111   :  { %722 = vmatprep.subr.mxu1 %v383_v27 }
 0x112   :  { %723 = vmatpush3.msra.mxu1 %v383_v27 }
 0x113   :  { %724 = vmatprep.subr.mxu1 %v382_v28 }
 0x114   :  { %725 = vmatpush3.msra.mxu1 %v382_v28 }
 0x115   :  { %726 = vmatprep.subr.mxu1 %v381_v29 }
 0x116   :  { %727 = vmatpush3.msra.mxu1 %v381_v29 }
 0x117   :  { %728 = vmatprep.subr.mxu1 %v380_v30 }
 0x118   :  { %729 = vmatpush3.msra.mxu1 %v380_v30 }
 0x1b9   :  { %v656_v15 = vpop.f32.mrf.mxu1 }
 0x1ba   :  { %v249_v16 = vadd.f32 %v656_v15, %v500_v14 }
 0x1bb   :  { %v243_v17 = vpop.f32.mrf.mxu1 }
 0x1bc   :  { %v244_v18 = vadd.f32 %v500_v14, %v243_v17  ;;  %v263_v21 = vmax.f32 %v249_v16, 0.0 }
 0x1bd   :  { %v659_v19 = vpop.f32.mrf.mxu1 }
 0x1be   :  { %v262_v20 = vmax.f32 %v244_v18, 0.0  ;;  %v259_v22 = vadd.f32 %v659_v19, %v500_v14 }
 0x1bf   :  { %v253_v23 = vpop.f32.mrf.mxu1 }
 0x1c0   :  { %v254_v24 = vadd.f32 %v500_v14, %v253_v23  ;;  %692 = vmatprep.mubr.f32.mxu0 %v262_v20  ;;  %v265_v26 = vmax.f32 %v259_v22, 0.0 }
 0x1c1   :  { %693 = vmatmul.mubr.f32.vlgmr.msra.gmra.mxu0 %v263_v21 }
 0x1c2   :  { %v264_v25 = vmax.f32 %v254_v24, 0.0 }
 0x1c4   :  { %695 = vmatprep.mubr.f32.mxu0 %v264_v25 }
 0x1c5   :  { %696 = vmatmul.mubr.f32.gmra.mxu0 %v265_v26 }
 0x281   :  { %v694_v32 = vpop.f32.mrf.mxu0 }
 0x282   :  { %v363_v33 = vadd.f32 %v694_v32, %v502_v31 }
 0x283   :  { %v357_v34 = vpop.f32.mrf.mxu0 }
 0x284   :  { %v358_v35 = vadd.f32 %v502_v31, %v357_v34  ;;  %v377_v38 = vmax.f32 %v363_v33, 0.0 }
 0x285   :  { %v697_v36 = vpop.f32.mrf.mxu0 }
 0x286   :  { %v376_v37 = vmax.f32 %v358_v35, 0.0  ;;  %v373_v39 = vadd.f32 %v697_v36, %v502_v31 }
 0x287   :  { %v367_v40 = vpop.f32.mrf.mxu0 }
 0x288   :  { %v368_v41 = vadd.f32 %v502_v31, %v367_v40  ;;  %730 = vmatprep.mubr.f32.mxu1 %v376_v37  ;;  %v379_v43 = vmax.f32 %v373_v39, 0.0 }
 0x289   :  { %731 = vmatmul.mubr.f32.vlgmr.msra.gmra.mxu1 %v377_v38 }
 0x28a   :  { %v378_v42 = vmax.f32 %v368_v41, 0.0 }
 0x28c   :  { %733 = vmatprep.mubr.f32.mxu1 %v378_v42 }
 0x28d   :  { %734 = vmatmul.mubr.f32.gmra.mxu1 %v379_v43 }
 0x349   :  { %v732_v45 = vpop.f32.mrf.mxu1 }
 0x34a   :  { %v475_v46 = vadd.f32 %v732_v45, %v503_v44 }
 0x34b   :  { %v469_v47 = vpop.f32.mrf.mxu1 }
 0x34c   :  { %490 = vst.msk [vmem:[%s886_s5 + $0x8] sm:$0xff] %vm488_vm0, %v475_v46  ;;  %v470_v48 = vadd.f32 %v503_v44, %v469_v47 }
 0x34d   :  { %v735_v49 = vpop.f32.mrf.mxu1 }
 0x34e   :  { %489 = vst.msk [vmem:[%s886_s5] sm:$0xff] %vm488_vm0, %v470_v48  ;;  %v485_v50 = vadd.f32 %v735_v49, %v503_v44 }
 0x34f   :  { %v479_v51 = vpop.f32.mrf.mxu1 }
 0x350   :  { %492 = vst.msk [vmem:[%s886_s5 + $0x18] sm:$0xff] %vm488_vm0, %v485_v50  ;;  %v480_v52 = vadd.f32 %v503_v44, %v479_v51 }
 0x352   :  { %491 = vst.msk [vmem:[%s886_s5 + $0x10] sm:$0xff] %vm488_vm0, %v480_v52 }
 0x353   :  { %497 = vsyncpa [#allocation4], 1 }

</bundles_post_ra>
